<compile_context>
chip_gen: v7x
topology: tpu7x:2x2x1
jax: 0.10.0
libtpu: 0.0.40
codegen_flags: <defaults>
</compile_context>

<pallas_src>
import jax
import jax.numpy as jnp
from jax.experimental import pallas as pl
from jax.experimental.pallas import tpu as pltpu


def _wmse_kernel(pred_ref, gt_ref, w_ref, vm_ref, out_ref, acc_ref):
    # pred_ref, gt_ref : (B*C, T) VMEM block (lane-dense flattened spatial tile)
    # w_ref, vm_ref    : (B,   T) VMEM block
    # out_ref          : (1, 1)   SMEM (final scalar loss)
    # acc_ref          : (2,)     SMEM scratch: [numer_partial, denom_partial]
    i = pl.program_id(0)

    @pl.when(i == 0)
    def _init():
        acc_ref[0] = jnp.float32(0.0)
        acc_ref[1] = jnp.float32(0.0)

    # Upcast in-kernel (inputs may arrive as bf16 etc.); keeps HBM traffic minimal.
    p = pred_ref[...].astype(jnp.float32)
    g = gt_ref[...].astype(jnp.float32)
    w = w_ref[...].astype(jnp.float32)
    vm = vm_ref[...].astype(jnp.float32)

    diff = p - g
    se = diff * diff                                   # (B*C, T)
    s_se = jnp.sum(se, axis=0, keepdims=True)          # (1, T): sum over b2 and c

    wv = w * vm                                        # (B, T)
    s_wv = jnp.sum(wv * vm, axis=0, keepdims=True)     # (1, T): sum_b1 vm^2 * w

    acc_ref[0] += jnp.sum(s_se * s_wv)                 # partial numerator
    acc_ref[1] += jnp.sum(wv)                          # partial denominator

    @pl.when(i == pl.num_programs(0) - 1)
    def _finalize():
        numer = acc_ref[0]
        denom = jnp.maximum(acc_ref[1], 1e-8)          # torch.clamp(min=1e-8)
        out_ref[0, 0] = jnp.minimum(numer / denom, 100.0)  # torch.clamp(max=100)


def _round_up(x, m):
    return ((x + m - 1) // m) * m


def weighted_mse_loss(pred, gt, weight, valid_masks, *, max_tile=2048):
    """pred/gt: (B,C,H,W); weight/valid_masks: (B,1,H,W). Returns scalar f32."""
    assert pred.size == gt.size
    B, C, H, W = pred.shape
    S = H * W
    BC = B * C

    # Layout glue only (contiguous reshapes): lane-dense last axis of size H*W.
    pred2 = pred.reshape(BC, S)
    gt2 = gt.reshape(BC, S)
    w2 = weight.reshape(B, S)
    vm2 = valid_masks.reshape(B, S)

    # Spatial tile: multiple of 128 lanes, sized so double-buffered blocks stay
    # well under the default scoped-VMEM limit on every TPU generation.
    ip = jnp.dtype(pred2.dtype).itemsize
    ig = jnp.dtype(gt2.dtype).itemsize
    iw = jnp.dtype(w2.dtype).itemsize
    iv = jnp.dtype(vm2.dtype).itemsize
    bytes_per_lane = 2 * (BC * (ip + ig) + B * (iw + iv))   # x2: double-buffering
    vmem_budget = 12 * 1024 * 1024                          # safe even on v5e
    t_cap = max(128, (vmem_budget // max(bytes_per_lane, 1)) // 128 * 128)
    tile = int(min(max_tile, t_cap, _round_up(S, 128)))

    s_pad = _round_up(S, tile)
    if s_pad != S:
        # Zero padding is exact: padded columns contribute 0 to numer and denom.
        pad = ((0, 0), (0, s_pad - S))
        pred2 = jnp.pad(pred2, pad)
        gt2 = jnp.pad(gt2, pad)
        w2 = jnp.pad(w2, pad)
        vm2 = jnp.pad(vm2, pad)

    grid = (s_pad // tile,)

    out = pl.pallas_call(
        _wmse_kernel,
        out_shape=jax.ShapeDtypeStruct((1, 1), jnp.float32),
        grid=grid,
        in_specs=[
            pl.BlockSpec((BC, tile), lambda i: (0, i)),
            pl.BlockSpec((BC, tile), lambda i: (0, i)),
            pl.BlockSpec((B, tile), lambda i: (0, i)),
            pl.BlockSpec((B, tile), lambda i: (0, i)),
        ],
        out_specs=pl.BlockSpec(memory_space=pltpu.MemorySpace.SMEM),
        scratch_shapes=[pltpu.SMEM((2,), jnp.float32)],
        compiler_params=pltpu.CompilerParams(
            dimension_semantics=("arbitrary",)),
    )(pred2, gt2, w2, vm2)
    return out[0, 0]


def _reference(pred, gt, weight, valid_masks):
    # Literal translation of the PyTorch forward (including the broadcast).
    se = jnp.sum((pred.astype(jnp.float32) - gt.astype(jnp.float32)) ** 2, axis=1)
    w = weight.astype(jnp.float32)
    vm = valid_masks.astype(jnp.float32)
    tem = se * vm                                    # (B, B, H, W) via broadcast
    numer = jnp.sum(tem * w * vm)
    denom = jnp.maximum(jnp.sum(w * vm), 1e-8)
    return jnp.minimum(numer / denom, 100.0)


if __name__ == "__main__":
    B, C, H, W = 2, 4, 16, 16
    key = jax.random.PRNGKey(0)
    k1, k2, k3, k4 = jax.random.split(key, 4)
    pred = jax.random.normal(k1, (B, C, H, W), dtype=jnp.float32)
    gt = jax.random.normal(k2, (B, C, H, W), dtype=jnp.float32)
    weight = jax.random.uniform(k3, (B, 1, H, W), dtype=jnp.float32)
    valid_masks = (jax.random.uniform(k4, (B, 1, H, W)) > 0.3).astype(jnp.float32)

    # Single-tile case.
    loss = weighted_mse_loss(pred, gt, weight, valid_masks)
    loss = jax.block_until_ready(loss)
    ref = _reference(pred, gt, weight, valid_masks)
    assert jnp.allclose(loss, ref, rtol=1e-5, atol=1e-5), (loss, ref)

    # Multi-tile case (forces grid > 1) to exercise the SMEM accumulator path.
    loss2 = weighted_mse_loss(pred, gt, weight, valid_masks, max_tile=128)
    loss2 = jax.block_until_ready(loss2)
    assert jnp.allclose(loss2, ref, rtol=1e-5, atol=1e-5), (loss2, ref)

    print("KERNEL_OK")
</pallas_src>

<mosaic_0001>
module attributes {stable_mosaic.version = 11 : i64} {
  func.func @_wmse_kernel(%arg0: i32, %arg1: memref<8x256xf32, #tpu.memory_space<vmem>>, %arg2: memref<8x256xf32, #tpu.memory_space<vmem>>, %arg3: memref<2x256xf32, #tpu.memory_space<vmem>>, %arg4: memref<2x256xf32, #tpu.memory_space<vmem>>, %arg5: memref<1x1xf32, #tpu.memory_space<smem>>, %arg6: memref<2xf32, #tpu.memory_space<smem>>) attributes {dimension_semantics = [#tpu.dimension_semantics<arbitrary>], iteration_bounds = array<i64: 1>, scalar_prefetch = 0 : i64, scratch_operands = 1 : i64, tpu.core_type = #tpu.core_type<tc>, window_params = [{transform_indices = @transform_0, window_bounds = array<i64: 8, 256>}, {transform_indices = @transform_1, window_bounds = array<i64: 8, 256>}, {transform_indices = @transform_2, window_bounds = array<i64: 2, 256>}, {transform_indices = @transform_3, window_bounds = array<i64: 2, 256>}, {transform_indices = @transform_4, window_bounds = array<i64: 1, 1>}]} {
    %c0_i32 = arith.constant 0 : i32
    %0 = arith.cmpi eq, %arg0, %c0_i32 : i32
    %1 = arith.extui %0 : i1 to i32
    %c0_i32_0 = arith.constant 0 : i32
    %2 = arith.cmpi ne, %1, %c0_i32_0 : i32
    scf.if %2 {
      %cst_16 = arith.constant 0.000000e+00 : f32
      %c0_17 = arith.constant 0 : index
      %33 = memref.load %arg6[%c0_17] : memref<2xf32, #tpu.memory_space<smem>>
      memref.store %cst_16, %arg6[%c0_17] : memref<2xf32, #tpu.memory_space<smem>>
      %cst_18 = arith.constant 0.000000e+00 : f32
      %c1_19 = arith.constant 1 : index
      %34 = memref.load %arg6[%c1_19] : memref<2xf32, #tpu.memory_space<smem>>
      memref.store %cst_18, %arg6[%c1_19] : memref<2xf32, #tpu.memory_space<smem>>
    } else {
    }
    %c0 = arith.constant 0 : index
    %c0_1 = arith.constant 0 : index
    %3 = vector.load %arg1[%c0, %c0_1] : memref<8x256xf32, #tpu.memory_space<vmem>>, vector<8x256xf32>
    %c0_2 = arith.constant 0 : index
    %c0_3 = arith.constant 0 : index
    %4 = vector.load %arg2[%c0_2, %c0_3] : memref<8x256xf32, #tpu.memory_space<vmem>>, vector<8x256xf32>
    %c0_4 = arith.constant 0 : index
    %c0_5 = arith.constant 0 : index
    %5 = vector.load %arg3[%c0_4, %c0_5] : memref<2x256xf32, #tpu.memory_space<vmem>>, vector<2x256xf32>
    %c0_6 = arith.constant 0 : index
    %c0_7 = arith.constant 0 : index
    %6 = vector.load %arg4[%c0_6, %c0_7] : memref<2x256xf32, #tpu.memory_space<vmem>>, vector<2x256xf32>
    %7 = arith.subf %3, %4 : vector<8x256xf32>
    %8 = arith.mulf %7, %7 : vector<8x256xf32>
    %cst = arith.constant dense<0.000000e+00> : vector<256xf32>
    %9 = vector.multi_reduction <add>, %8, %cst [0] : vector<8x256xf32> to vector<256xf32>
    %10 = vector.shape_cast %9 : vector<256xf32> to vector<1x256xf32>
    %11 = arith.mulf %5, %6 : vector<2x256xf32>
    %12 = arith.mulf %11, %6 : vector<2x256xf32>
    %cst_8 = arith.constant dense<0.000000e+00> : vector<256xf32>
    %13 = vector.multi_reduction <add>, %12, %cst_8 [0] : vector<2x256xf32> to vector<256xf32>
    %14 = vector.shape_cast %13 : vector<256xf32> to vector<1x256xf32>
    %c0_9 = arith.constant 0 : index
    %15 = memref.load %arg6[%c0_9] : memref<2xf32, #tpu.memory_space<smem>>
    %16 = arith.mulf %10, %14 : vector<1x256xf32>
    %17 = vector.shape_cast %16 : vector<1x256xf32> to vector<1x1x256xf32>
    %cst_10 = arith.constant dense<0.000000e+00> : vector<1xf32>
    %18 = vector.multi_reduction <add>, %17, %cst_10 [1, 2] : vector<1x1x256xf32> to vector<1xf32>
    %19 = vector.shape_cast %18 : vector<1xf32> to vector<1x1x1xf32>
    %20 = vector.extract %19[0, 0, 0] : f32 from vector<1x1x1xf32>
    %21 = arith.addf %15, %20 : f32
    %c0_11 = arith.constant 0 : index
    %22 = memref.load %arg6[%c0_11] : memref<2xf32, #tpu.memory_space<smem>>
    memref.store %21, %arg6[%c0_11] : memref<2xf32, #tpu.memory_space<smem>>
    %c1 = arith.constant 1 : index
    %23 = memref.load %arg6[%c1] : memref<2xf32, #tpu.memory_space<smem>>
    %24 = vector.shape_cast %11 : vector<2x256xf32> to vector<1x2x256xf32>
    %cst_12 = arith.constant dense<0.000000e+00> : vector<1xf32>
    %25 = vector.multi_reduction <add>, %24, %cst_12 [1, 2] : vector<1x2x256xf32> to vector<1xf32>
    %26 = vector.shape_cast %25 : vector<1xf32> to vector<1x1x1xf32>
    %27 = vector.extract %26[0, 0, 0] : f32 from vector<1x1x1xf32>
    %28 = arith.addf %23, %27 : f32
    %c1_13 = arith.constant 1 : index
    %29 = memref.load %arg6[%c1_13] : memref<2xf32, #tpu.memory_space<smem>>
    memref.store %28, %arg6[%c1_13] : memref<2xf32, #tpu.memory_space<smem>>
    %c0_i32_14 = arith.constant 0 : i32
    %30 = arith.cmpi eq, %arg0, %c0_i32_14 : i32
    %31 = arith.extui %30 : i1 to i32
    %c0_i32_15 = arith.constant 0 : i32
    %32 = arith.cmpi ne, %31, %c0_i32_15 : i32
    scf.if %32 {
      %c0_16 = arith.constant 0 : index
      %33 = memref.load %arg6[%c0_16] : memref<2xf32, #tpu.memory_space<smem>>
      %c1_17 = arith.constant 1 : index
      %34 = memref.load %arg6[%c1_17] : memref<2xf32, #tpu.memory_space<smem>>
      %cst_18 = arith.constant 9.99999993E-9 : f32
      %35 = arith.maximumf %34, %cst_18 : f32
      %36 = arith.divf %33, %35 : f32
      %cst_19 = arith.constant 1.000000e+02 : f32
      %37 = arith.minimumf %36, %cst_19 : f32
      %c0_20 = arith.constant 0 : index
      %c0_21 = arith.constant 0 : index
      %38 = memref.load %arg5[%c0_20, %c0_21] : memref<1x1xf32, #tpu.memory_space<smem>>
      memref.store %37, %arg5[%c0_20, %c0_21] : memref<1x1xf32, #tpu.memory_space<smem>>
    } else {
    }
    return
  }
  func.func @transform_0(%arg0: i32) -> (i32, i32) {
    %c0_i32 = arith.constant 0 : i32
    %c0_i32_0 = arith.constant 0 : i32
    return %c0_i32, %arg0 : i32, i32
  }
  func.func @transform_1(%arg0: i32) -> (i32, i32) {
    %c0_i32 = arith.constant 0 : i32
    %c0_i32_0 = arith.constant 0 : i32
    return %c0_i32, %arg0 : i32, i32
  }
  func.func @transform_2(%arg0: i32) -> (i32, i32) {
    %c0_i32 = arith.constant 0 : i32
    %c0_i32_0 = arith.constant 0 : i32
    return %c0_i32, %arg0 : i32, i32
  }
  func.func @transform_3(%arg0: i32) -> (i32, i32) {
    %c0_i32 = arith.constant 0 : i32
    %c0_i32_0 = arith.constant 0 : i32
    return %c0_i32, %arg0 : i32, i32
  }
  func.func @transform_4(%arg0: i32) -> (i32, i32) {
    %c0_i32 = arith.constant 0 : i32
    %c0_i32_0 = arith.constant 0 : i32
    %c0_i32_1 = arith.constant 0 : i32
    return %c0_i32, %c0_i32_0 : i32, i32
  }
}

</mosaic_0001>

<bundles_post_ra>
// kernel: tpu_custom_call.1
= control target key start
LH: loop header
LB: loop body
LE: loop exit
PB: predicated region body
PF: predicated region fallthrough
CT: control target
= control target key end

     0   :  { %9 = vsyncpa [#allocation4], 0  ;;  %s327_s0 = inlined_call_operand.hbm [shape: f32[8,256], index: 0, kind: input, shape index: {}]   ;;  %s328_s1 = inlined_call_operand.hbm [shape: f32[8,256], index: 1, kind: input, shape index: {}]   ;;  %s329_s2 = inlined_call_operand.vmem [shape: f32[2,256], index: 2, kind: input, shape index: {}]   ;;  %s330_s3 = inlined_call_operand.vmem [shape: f32[2,256], index: 3, kind: input, shape index: {}]   ;;  %s331_s4 = inlined_call_operand.hbm [shape: f32[1,1], index: 4, kind: output, shape index: {}]  }
   0x1   :  { %10 = vsyncpa [#allocation7], 0 }
   0x2   :  { %11 = vsyncpa [#allocation5], 0  ;;  %s250_s15 = smov [#allocation3]   ;;  %s251_s17 = smov [#allocation6]  }
   0x3   :  { %s18_s16 = sshll.u32 %s250_s15, 4  ;;  %s28_s18 = sshll.u32 %s251_s17, 4  ;;  %s19_s16 = int_to_ptr.vmem [resolvable:$true] %s18_s16  ;;  %s29_s18 = int_to_ptr.vmem [resolvable:$true] %s28_s18 }
   0x4   :  { %s190_s21 = scalar_lea.hbm %s327_s0, 256 }
   0x5   :  { %p191_p0 = scmp.ne.s32.totalorder %s327_s0, %s190_s21  ;;  %p194_p1 = scmp.lt.u32.totalorder %s190_s21, %s327_s0 }
   0x7   :  { %p196_p2 = pnand %p194_p1, %p191_p0 }
   0x9   :  { %199 = shalt.err (!%p196_p2)
}
   0xa   :  { %s200_s26 = scalar_lea.vmem %s19_s16, 256  ;;  %p205_p4 = scmp.lt.s32.totalorder %s19_s16, %s19_s16 }
   0xb   :  { %p201_p3 = scmp.ne.s32.totalorder %s19_s16, %s200_s26  ;;  %p206_p5 = scmp.lt.s32.totalorder %s200_s26, %s200_s26 }
   0xd   :  { %p207_p6 = por %p206_p5, %p205_p4 }
   0xf   :  { %p208_p7 = pnand %p207_p6, %p201_p3 }
  0x11   :  { %211 = shalt.err (!%p208_p7)
}
  0x12   :  { %21 = dma.hbm_to_vmem [thread:$0]  %s327_s0, 256, %s19_s16, [#allocation4]  }
  0x13   :  { %s212_s5 = scalar_lea.hbm %s328_s1, 256 }
  0x14   :  { %p213_p8 = scmp.ne.s32.totalorder %s328_s1, %s212_s5  ;;  %p216_p9 = scmp.lt.u32.totalorder %s212_s5, %s328_s1 }
  0x16   :  { %p218_p10 = pnand %p216_p9, %p213_p8 }
  0x18   :  { %221 = shalt.err (!%p218_p10)
}
  0x19   :  { %s222_s10 = scalar_lea.vmem %s29_s18, 256  ;;  %p227_p12 = scmp.lt.s32.totalorder %s29_s18, %s29_s18 }
  0x1a   :  { %p223_p11 = scmp.ne.s32.totalorder %s29_s18, %s222_s10  ;;  %p228_p13 = scmp.lt.s32.totalorder %s222_s10, %s222_s10 }
  0x1c   :  { %p229_p0 = por %p228_p13, %p227_p12 }
  0x1e   :  { %p230_p1 = pnand %p229_p0, %p223_p11 }
  0x20   :  { %233 = shalt.err (!%p230_p1)
}
  0x21   :  { %31 = dma.hbm_to_vmem [thread:$0]  %s328_s1, 256, %s29_s18, [#allocation7]  }
  0x22   :  { %244 = dma.done.wait [#allocation4], 256  }
  0x23   :  { %245 = vsyncadd [#allocation4], 4294967040 }
  0x24   :  { %246 = dma.done.wait [#allocation7], 256  }
  0x25   :  { %247 = vsyncadd [#allocation7], 4294967040  ;;  %v252_v0 = vmov 1983009808   ;;  %v78_v2 = vlaneseq  ;;  %v50_v5 = vld [vmem:[#allocation3] sm:$0xff]  ;;  %v51_v6 = vld [vmem:[#allocation3 + $0x8] sm:$0xff] }
  0x26   :  { %v76_v1 = vunpack.c.l.s4 %v252_v0  ;;  %v52_v7 = vld [vmem:[#allocation6] sm:$0xff]  ;;  %v53_v8 = vld [vmem:[#allocation6 + $0x8] sm:$0xff]  ;;  %v54_v9 = vld [vmem:[%s329_s2] sm:$0xf]  ;;  %vm85_vm0 = vcmask 1041408   ;;  %vm103_vm1 = vcmask 1040384  }
  0x27   :  { %v79_v4 = vshrl.u32 %v78_v2, 7  ;;  %v55_v10 = vld [vmem:[%s330_s3] sm:$0xf]  ;;  %v56_v11 = vsub.f32 %v50_v5, %v52_v7  ;;  %v57_v12 = vsub.f32 %v51_v6, %v53_v8  ;;  %s253_s3 = smov 1e-08   ;;  %s254_s19 = smov 100.0  }
  0x28   :  { %v77_v3 = vunpack.c.0.s8 %v76_v1  ;;  %v72_v13 = vmul.f32 %v55_v10, %v54_v9  ;;  %s234_s23 = scalar_lea.hbm %s331_s4, 16 }
  0x29   :  { %v58_v15 = vmul.f32 %v56_v11, %v56_v11  ;;  %v59_v16 = vmul.f32 %v57_v12, %v57_v12  ;;  %p235_p2 = scmp.ne.s32.totalorder %s331_s4, %s234_s23  ;;  %p238_p3 = scmp.lt.u32.totalorder %s234_s23, %s331_s4 }
  0x2a   :  { %v80_v14 = vsub.s32 %v77_v3, %v79_v4  ;;  %v73_v17 = vmul.f32 %v72_v13, %v55_v10 }
  0x2b   :  { %v60_v18 = vrot.slane %v58_v15, 4  ;;  %v66_v19 = vrot.slane %v59_v16, 4  ;;  %p240_p4 = pnand %p238_p3, %p235_p2 }
  0x2c   :  { %v81_v20 = vrot.slane %v73_v17, %v80_v14  ;;  %v127_v42 = vrot.slane %v72_v13, %v80_v14 }
  0x2d   :  { %v61_v21 = vadd.f32 %v60_v18, %v58_v15  ;;  %v67_v22 = vadd.f32 %v66_v19, %v59_v16 }
  0x2e   :  { %v82_v23 = vcombine.high %v81_v20, %v81_v20  ;;  %v86_v24 = vsel %vm85_vm0, %v81_v20, 0.0  ;;  %v128_v48 = vcombine.high %v127_v42, %v127_v42  ;;  %v131_v52 = vsel %vm85_vm0, %v127_v42, 0.0 }
  0x2f   :  { %v62_v25 = vrot.slane %v61_v21, 2  ;;  %v87_v26 = vrot.slane %v86_v24, 4  ;;  %v68_v27 = vrot.slane %v67_v22, 2 }
  0x30   :  { %v93_v28 = vsel %vm85_vm0, %v82_v23, 0.0  ;;  %v132_v53 = vsel %vm85_vm0, %v128_v48, 0.0 }
  0x31   :  { %v63_v29 = vadd.f32 %v62_v25, %v61_v21  ;;  %v88_v30 = vadd.f32 %v87_v26, %v86_v24  ;;  %v94_v31 = vrot.slane %v93_v28, 4  ;;  %v69_v32 = vadd.f32 %v68_v27, %v67_v22 }
  0x32   :  { %v133_v55 = vadd.f32 %v132_v53, %v131_v52 }
  0x33   :  { %v64_v33 = vrot.slane %v63_v29, 1  ;;  %v89_v34 = vrot.slane %v88_v30, 2  ;;  %v95_v35 = vadd.f32 %v94_v31, %v93_v28  ;;  %v70_v36 = vrot.slane %v69_v32, 1 }
  0x35   :  { %v90_v37 = vadd.f32 %v89_v34, %v88_v30  ;;  %v96_v38 = vrot.slane %v95_v35, 2  ;;  %v65_v39 = vadd.f32 %v64_v33, %v63_v29  ;;  %v71_v43 = vadd.f32 %v70_v36, %v69_v32 }
  0x37   :  { %v91_v40 = vrot.slane %v90_v37, 1  ;;  %v97_v41 = vadd.f32 %v96_v38, %v95_v35 }
  0x39   :  { %v92_v44 = vadd.f32 %v91_v40, %v90_v37  ;;  %v98_v45 = vrot.slane %v97_v41, 1 }
  0x3b   :  { %v99_v46 = vadd.f32 %v98_v45, %v97_v41  ;;  %v101_v47 = vmul.f32 %v92_v44, %v65_v39 }
  0x3d   :  { %v102_v49 = vmul.f32 %v99_v46, %v71_v43  ;;  %v104_v50 = vsel %vm103_vm1, %v101_v47, 0.0 }
  0x3f   :  { %v105_v51 = vsel %vm103_vm1, %v102_v49, 0.0 }
  0x40   :  { %v106_v54 = vadd.f32 %v105_v51, %v104_v50 }
  0x42   :  { %107 = vadd.xlane.f32.xlu0 %v106_v54 }
  0x46   :  { %134 = vadd.xlane.f32.xlu0 %v133_v55 }
  0xcf   :  { %v108_v56 = vpop.xlane.xlu0 %107 }
  0xd0   :  { %v109_v57 = vrot.slane %v108_v56, 4 }
  0xd2   :  { %v110_v58 = vadd.f32 %v109_v57, %v108_v56 }
  0xd3   :  { %v135_v59 = vpop.xlane.xlu0 %134 }
  0xd4   :  { %v111_v60 = vrot.slane %v110_v58, 2  ;;  %v136_v61 = vrot.slane %v135_v59, 4 }
  0xd6   :  { %v137_v62 = vadd.f32 %v136_v61, %v135_v59  ;;  %v112_v63 = vadd.f32 %v111_v60, %v110_v58 }
  0xd8   :  { %v138_v0 = vrot.slane %v137_v62, 2  ;;  %v113_v1 = vrot.slane %v112_v63, 1 }
  0xda   :  { %v139_v2 = vadd.f32 %v138_v0, %v137_v62  ;;  %v114_v3 = vadd.f32 %v113_v1, %v112_v63 }
  0xdc   :  { %176 = vpush %v114_v3  ;;  %v140_v4 = vrot.slane %v139_v2, 1 }
  0xde   :  { %v141_v5 = vadd.f32 %v140_v4, %v139_v2 }
  0xe0   :  { %178 = vpush %v141_v5 }
 0x10d   :  { %s177_s1 = spop %176 }
 0x111   :  { %s179_s2 = spop %178 }
 0x112   :  { %s151_s16 = smax.f32 %s253_s3, %s179_s2 }
 0x113   :  { %v152_v6 = vstv %s151_s16 }
 0x114   :  { %188 = vrcp.f32 %v152_v6 }
 0x11e   :  { %v189_v7 = vpop.eup %188 }
 0x11f   :  { %180 = vpush %v189_v7 }
 0x150   :  { %s181_s17 = spop %180 }
 0x151   :  { %s155_s18 = smul.f32 %s181_s17, %s177_s1 }
 0x153   :  { %s156_s20 = smin.f32 %s254_s19, %s155_s18 }
 0x154   :  { %158 = sst [smem:[#allocation8]] %s156_s20 }
 0x155   :  { %243 = shalt.err (!%p240_p4)
}
 0x156   :  { %s255_s28 = smov [#allocation8]  }
 0x157   :  { %166 = dma.smem_to_hbm %s255_s28, 16, %s331_s4, [#allocation5]  }
 0x158   :  { %248 = dma.done.wait [#allocation5], 16  }
 0x159   :  { %249 = vsyncadd [#allocation5], 4294967280 }
 0x15a   :  { %170 = sfence }
 0x15b   :  { %171 = vsyncpa [#allocation4], 1 }
 0x15c   :  { %172 = vsyncpa [#allocation7], 1 }
 0x15d   :  { %173 = vsyncpa [#allocation5], 1 }

</bundles_post_ra>
